<compile_context>
chip_gen: v7x
topology: tpu7x:2x2x1
jax: 0.10.0
libtpu: 0.0.40
codegen_flags: <defaults>
</compile_context>

<pallas_src>
import jax
import jax.numpy as jnp
from jax.experimental import pallas as pl
from jax.experimental.pallas import tpu as pltpu


def _critic_head_kernel(x_ref, w_ref, b_ref, o_ref):
    # x_ref: [tm, F]  (VMEM, pipelined over batch tiles)
    # w_ref: [1,  F]  (VMEM, lane-dense; constant index_map -> fetched once)
    # b_ref: [1,  1]  (SMEM scalar)
    # o_ref: [tm, 1]
    x = x_ref[...].astype(jnp.float32)
    w = w_ref[...].astype(jnp.float32)          # broadcasts over the tm rows
    # VPU elementwise multiply + XLU lane reduction; both units have idle slots
    # in this HBM-bandwidth-bound kernel, and this avoids a degenerate N=1 MXU
    # matmul / pathological [F, 1] weight layout.
    y = jnp.sum(x * w, axis=-1, keepdims=True)  # [tm, 1], f32 accumulation
    o_ref[...] = (y + b_ref[0, 0]).astype(o_ref.dtype)


def _round_up(n, m):
    return ((n + m - 1) // m) * m


def _choose_tile_m(batch, feat, itemsize):
    """Batch-tile rows.

    Byte-capped (not row-capped): tm grows until the x tile is ~4 MiB per
    pipeline buffer (~8 MiB double-buffered), the HBM-roofline sweet spot on
    v5e/v6e/v7x, bounded only by the batch.  When the whole batch fits in one
    tile we still split into >=2 tiles (if batch > 16) so both v7x TensorCores
    get work.  The returned tm is either a multiple of 8 or the full batch,
    both of which satisfy the (8, 128) block-shape rule.
    """
    target_bytes = 4 * 1024 * 1024
    rows = max(8, (target_bytes // max(1, feat * itemsize)) // 8 * 8)
    if batch <= rows:
        if batch > 16:
            # >=2 grid steps -> megacore sharding on v7x; no-op on v5e/v6e.
            return min(rows, _round_up(pl.cdiv(batch, 2), 8))
        return batch        # single block == full array dims (always legal)
    return rows


def critic_head(x, weight, bias):
    """Pallas equivalent of PyTorch nn.Linear(input_size, 1)(x).

    x:      [B, F]   f32 or bf16.  bf16 halves HBM traffic (this kernel is
                     purely HBM-bandwidth-bound); accumulation is f32 either way.
    weight: [1, F]   PyTorch Linear weight layout (out_features=1), lane-dense.
    bias:   [1]
    returns [B, 1] in x.dtype
    """
    B, F = x.shape
    tm = _choose_tile_m(B, F, x.dtype.itemsize)
    num_tiles = pl.cdiv(B, tm)              # ragged last block handled by Pallas

    w_in = weight.reshape(1, F)                     # lane-dense weight
    b_in = bias.reshape(1, 1).astype(jnp.float32)   # scalar for SMEM

    # VMEM budget (worst case, f32 x, 4 MiB tile): 2 x-buffers (8 MiB)
    # + f32 cast/product temps (<= 8 MiB) + 2 small weight buffers + out
    # << 40 MiB, which fits v7x's 64 MiB physical VMEM and overrides v5e's
    # 16 MiB default scoped limit.
    # TODO(synk): for very large F (>~100K) add an "arbitrary" F grid axis with
    # a [tm, 1] f32 scratch accumulator to keep the x tile inside this budget.
    out = pl.pallas_call(
        _critic_head_kernel,
        out_shape=jax.ShapeDtypeStruct((B, 1), x.dtype),
        grid=(num_tiles,),
        in_specs=[
            pl.BlockSpec((tm, F), lambda i: (i, 0)),            # x: tiled over batch
            pl.BlockSpec((1, F), lambda i: (0, 0)),             # weight: resident
            pl.BlockSpec(memory_space=pltpu.MemorySpace.SMEM),  # bias: SMEM scalar
        ],
        out_specs=pl.BlockSpec((tm, 1), lambda i: (i, 0)),
        compiler_params=pltpu.CompilerParams(
            dimension_semantics=("parallel",),   # batch tiles shard across v7x's 2 TCs
            vmem_limit_bytes=40 * 1024 * 1024,
        ),
    )(x, w_in, b_in)
    return out


def make_critic_head_params(input_size, key):
    """Mimic the module's __init__: orthogonal_(weight) for a (1, input_size)
    matrix == unit-norm random row; constant_(bias, 0)."""
    w = jax.random.normal(key, (1, input_size), dtype=jnp.float32)
    w = w / jnp.linalg.norm(w)
    b = jnp.zeros((1,), dtype=jnp.float32)
    return w, b


if __name__ == "__main__":
    key = jax.random.PRNGKey(0)
    k_x, k_w, k_x2 = jax.random.split(key, 3)

    input_size = 32
    weight, bias = make_critic_head_params(input_size, k_w)

    # Small shape consistent with the module.
    batch = 2
    x = jax.random.normal(k_x, (batch, input_size), dtype=jnp.float32)
    out = jax.block_until_ready(critic_head(x, weight, bias))
    ref = jnp.sum(x * weight, axis=-1, keepdims=True) + bias
    assert out.shape == (batch, 1)
    assert jnp.allclose(out, ref, atol=1e-5, rtol=1e-5)

    # Ragged-batch check: exercises the no-pad cdiv grid with a masked partial
    # last block (batch=20 -> tm=16 -> 2 tiles, last one 4 valid rows).
    batch2 = 20
    x2 = jax.random.normal(k_x2, (batch2, input_size), dtype=jnp.float32)
    out2 = jax.block_until_ready(critic_head(x2, weight, bias))
    ref2 = jnp.sum(x2 * weight, axis=-1, keepdims=True) + bias
    assert out2.shape == (batch2, 1)
    assert jnp.allclose(out2, ref2, atol=1e-5, rtol=1e-5)

    print("KERNEL_OK")
</pallas_src>

<mosaic_0001>
module attributes {stable_mosaic.version = 11 : i64} {
  func.func @_critic_head_kernel(%arg0: i32, %arg1: memref<2x32xf32, #tpu.memory_space<vmem>>, %arg2: memref<1x32xf32, #tpu.memory_space<vmem>>, %arg3: memref<1x1xf32, #tpu.memory_space<smem>>, %arg4: memref<2x1xf32, #tpu.memory_space<vmem>>) attributes {dimension_semantics = [#tpu.dimension_semantics<parallel>], iteration_bounds = array<i64: 1>, scalar_prefetch = 0 : i64, scratch_operands = 0 : i64, tpu.core_type = #tpu.core_type<tc>, window_params = [{transform_indices = @transform_0, window_bounds = array<i64: 2, 32>}, {pipeline_mode = #tpu.pipeline_mode<synchronous>, transform_indices = @transform_1, window_bounds = array<i64: 1, 32>}, {transform_indices = @transform_2, window_bounds = array<i64: 1, 1>}, {transform_indices = @transform_3, window_bounds = array<i64: 2, 1>}]} {
    %c0 = arith.constant 0 : index
    %c0_0 = arith.constant 0 : index
    %0 = vector.load %arg1[%c0, %c0_0] : memref<2x32xf32, #tpu.memory_space<vmem>>, vector<2x32xf32>
    %c0_1 = arith.constant 0 : index
    %c0_2 = arith.constant 0 : index
    %1 = vector.load %arg2[%c0_1, %c0_2] : memref<1x32xf32, #tpu.memory_space<vmem>>, vector<1x32xf32>
    %2 = vector.broadcast %1 : vector<1x32xf32> to vector<2x32xf32>
    %3 = arith.mulf %0, %2 : vector<2x32xf32>
    %cst = arith.constant dense<0.000000e+00> : vector<2xf32>
    %4 = vector.multi_reduction <add>, %3, %cst [1] : vector<2x32xf32> to vector<2xf32>
    %5 = vector.shape_cast %4 : vector<2xf32> to vector<2x1xf32>
    %c0_3 = arith.constant 0 : index
    %c0_4 = arith.constant 0 : index
    %6 = memref.load %arg3[%c0_3, %c0_4] : memref<1x1xf32, #tpu.memory_space<smem>>
    %7 = vector.broadcast %6 : f32 to vector<2x1xf32>
    %8 = arith.addf %5, %7 : vector<2x1xf32>
    %c0_5 = arith.constant 0 : index
    %c0_6 = arith.constant 0 : index
    %9 = vector.load %arg4[%c0_5, %c0_6] : memref<2x1xf32, #tpu.memory_space<vmem>>, vector<2x1xf32>
    tpu.vector_store %arg4[%c0_5, %c0_6], %8 {strides = array<i32>} : memref<2x1xf32, #tpu.memory_space<vmem>>, vector<2x1xf32>,
    return
  }
  func.func @transform_0(%arg0: i32) -> (i32, i32) {
    %c0_i32 = arith.constant 0 : i32
    %c0_i32_0 = arith.constant 0 : i32
    return %arg0, %c0_i32 : i32, i32
  }
  func.func @transform_1(%arg0: i32) -> (i32, i32) {
    %c0_i32 = arith.constant 0 : i32
    %c0_i32_0 = arith.constant 0 : i32
    %c0_i32_1 = arith.constant 0 : i32
    return %c0_i32, %c0_i32_0 : i32, i32
  }
  func.func @transform_2(%arg0: i32) -> (i32, i32) {
    %c0_i32 = arith.constant 0 : i32
    %c0_i32_0 = arith.constant 0 : i32
    %c0_i32_1 = arith.constant 0 : i32
    return %c0_i32, %c0_i32_0 : i32, i32
  }
  func.func @transform_3(%arg0: i32) -> (i32, i32) {
    %c0_i32 = arith.constant 0 : i32
    %c0_i32_0 = arith.constant 0 : i32
    return %arg0, %c0_i32 : i32, i32
  }
}

</mosaic_0001>

<bundles_post_ra>
// kernel: tpu_custom_call.1
= control target key start
LH: loop header
LB: loop body
LE: loop exit
PB: predicated region body
PF: predicated region fallthrough
CT: control target
= control target key end

     0   :  { %vm24_vm0 = vcmask 254976   ;;  %vm31_vm1 = vcmask 1024   ;;  %s70_s0 = inlined_call_operand.vmem [shape: f32[2,32], index: 0, kind: input, shape index: {}]   ;;  %s71_s1 = inlined_call_operand.vmem [shape: f32[1,32], index: 1, kind: input, shape index: {}]   ;;  %s72_s2 = inlined_call_operand.<no memory space> [shape: f32[1,1], index: 2, kind: input, shape index: {}]   ;;  %s73_s3 = inlined_call_operand.vmem [shape: f32[2,1], index: 3, kind: output, shape index: {}]  }
   0x1   :  { %v15_v0 = vld [vmem:[%s70_s0] sm:$0x3]  ;;  %v29_v4 = vstv %s72_s2 }
   0x2   :  { %v37_v1 = vld [vmem:[%s71_s1] ss:$0 sm:$0xff] }
   0x3   :  { %v23_v2 = vmul.f32 %v37_v1, %v15_v0 }
   0x5   :  { %v25_v3 = vsel %vm24_vm0, %v23_v2, 0.0 }
   0x6   :  { %26 = vadd.xlane.f32.xlu0 %v25_v3 }
  0x93   :  { %v27_v5 = vpop.xlane.xlu0 %26 }
  0x94   :  { %v30_v6 = vadd.f32 %v29_v4, %v27_v5 }
  0x96   :  { %32 = vst.msk [vmem:[%s73_s3] sm:$0x3] %vm31_vm1, %v30_v6 }

</bundles_post_ra>
